<compile_context>
chip_gen: v7x
topology: tpu7x:2x2x1
jax: 0.10.0
libtpu: 0.0.40
codegen_flags: <defaults>
</compile_context>

<pallas_src>
import jax
import jax.numpy as jnp
from jax.experimental import pallas as pl
from jax.experimental.pallas import tpu as pltpu

# Small synthetic config
SUB = 4        # temporal subsampling factor (frame stacking)
D_MODEL = 32   # encoder hidden size
D_FF = 64      # feed-forward hidden size
D_PROJ = 32    # encoder_decoder_proj output size

LANE = 128       # TPU lane width: hidden/output channel dims padded to this
SUBLANE = 8      # f32 sublane granularity (bias slab rows)
ROW_ALIGN = 16   # bf16 sublane packing: keep row tiles multiples of 16
MAX_ROW_TILE = 2048


def _round_up(x, m):
    return (x + m - 1) // m * m


def _pad2(a, rows, cols):
    """Zero-pad a 2-D array up to (rows, cols)."""
    return jnp.pad(a, ((0, rows - a.shape[0]), (0, cols - a.shape[1])))


def _encoder_kernel(xs_ref, w_ref, b_ref, out_ref):
    """Row-tiled encoder + projection.

    xs_ref : (R, cin)             bf16  -- native channel width, no lane padding
    w_ref  : (cin_rows+3*128, 128) bf16 -- [w_sub | w1 | w2 | w_proj] stacked
    b_ref  : (8, 128)             f32   -- rows: b_sub,b1,b2,gamma,beta,b_proj
    out_ref: (R, 128)             bf16  -- lane-dense output (D_PROJ real lanes)

    Matmuls take bf16 inputs with f32 accumulation; LayerNorm / ReLU / residual
    stay in f32.  All padded lanes of h/u/f are exactly zero (zero-padded
    weights & biases), so the LayerNorm statistics over 128 lanes are exact for
    the real D_MODEL channels with no mask math.
    """
    cin = xs_ref.shape[-1]
    off = _round_up(cin, LANE)     # start row of w1 inside the weight slab

    b_sub = b_ref[0:1, :]
    b1 = b_ref[1:2, :]
    b2 = b_ref[2:3, :]
    gamma = b_ref[3:4, :]
    beta = b_ref[4:5, :]
    b_proj = b_ref[5:6, :]

    x = xs_ref[...]                                            # (R, cin) bf16

    # pre_encode: strided-conv-equivalent frame projection + ReLU
    h = jnp.dot(x, w_ref[0:cin, :],
                preferred_element_type=jnp.float32) + b_sub
    h = jnp.maximum(h, 0.0)                                    # (R, 128) f32

    # conformer-style half-FFN residual block
    u = jnp.dot(h.astype(jnp.bfloat16), w_ref[off:off + LANE, :],
                preferred_element_type=jnp.float32) + b1
    u = jnp.maximum(u, 0.0)                                    # (R, 128)
    f = jnp.dot(u.astype(jnp.bfloat16), w_ref[off + LANE:off + 2 * LANE, :],
                preferred_element_type=jnp.float32) + b2
    h = h + 0.5 * f                                            # (R, 128)

    # LayerNorm over the real D_MODEL channels (padded lanes of h are zero, so
    # the 128-lane sums already equal the true D_MODEL-channel sums).
    inv_d = 1.0 / D_MODEL
    mu = jnp.sum(h, axis=-1, keepdims=True) * inv_d
    var = jnp.sum(h * h, axis=-1, keepdims=True) * inv_d - mu * mu
    hn = (h - mu) * jax.lax.rsqrt(var + 1e-5) * gamma + beta   # padded lanes -> 0

    # encoder_decoder_proj (Linear)
    y = jnp.dot(hn.astype(jnp.bfloat16), w_ref[off + 2 * LANE:off + 3 * LANE, :],
                preferred_element_type=jnp.float32) + b_proj
    out_ref[...] = y.astype(out_ref.dtype)                     # (R, 128) bf16


def encoder_wrapper_forward(params, x, x_len):
    """
    Args:
      x:     (N, T, C) float32
      x_len: (N,)      int32
    Returns:
      enc_states:  (N, T', D_PROJ) float32
      encoded_len: (N,)            int32
      enc_mask:    (N, T')         bool
    """
    N, T, C = x.shape
    Tp = T // SUB
    T_use = Tp * SUB          # guard: trim T to a multiple of SUB
    cin = SUB * C

    # frame stacking (glue): equivalent to permute(0,2,1) + kernel=stride=SUB
    # gather; shipped to the kernel at native channel width in bf16.
    xs = x[:, :T_use, :].reshape(N, Tp, cin).astype(jnp.bfloat16)

    # Flatten batch into the row dim; pick a large, aligned row tile.
    rows = N * Tp
    rows_al = _round_up(rows, ROW_ALIGN)
    tile_rows = min(rows_al, MAX_ROW_TILE)
    # v7x: keep at least 2 grid steps (when the problem is big enough) so the
    # "parallel" grid axis can shard across both TensorCores.
    if rows_al // tile_rows < 2 and rows_al >= 2 * ROW_ALIGN:
        tile_rows = _round_up((rows_al + 1) // 2, ROW_ALIGN)
    rows_p = _round_up(rows_al, tile_rows)
    num_tiles = rows_p // tile_rows

    xs_p = _pad2(xs.reshape(rows, cin), rows_p, cin)

    # Single bf16 weight slab: [w_sub (cin_rows) | w1 | w2 | w_proj] x 128 lanes.
    cin_rows = _round_up(cin, LANE)
    w_slab = jnp.concatenate(
        [
            _pad2(params["w_sub"].astype(jnp.float32), cin_rows, LANE),
            _pad2(params["w1"].astype(jnp.float32), LANE, LANE),
            _pad2(params["w2"].astype(jnp.float32), LANE, LANE),
            _pad2(params["w_proj"].astype(jnp.float32), LANE, LANE),
        ],
        axis=0,
    ).astype(jnp.bfloat16)                                   # (cin_rows+384, 128)

    # Single f32 bias/LN slab: rows = b_sub, b1, b2, gamma, beta, b_proj, 0, 0.
    def _pad_vec(v):
        v = v.reshape(-1).astype(jnp.float32)
        return jnp.pad(v, (0, LANE - v.shape[0]))

    bias_slab = jnp.stack(
        [_pad_vec(params[k]) for k in
         ("b_sub", "b1", "b2", "ln_gamma", "ln_beta", "b_proj")]
        + [jnp.zeros((LANE,), jnp.float32)] * 2
    )                                                        # (8, 128)

    out_p = pl.pallas_call(
        _encoder_kernel,
        out_shape=jax.ShapeDtypeStruct((rows_p, LANE), jnp.bfloat16),
        grid=(num_tiles,),
        in_specs=[
            pl.BlockSpec((tile_rows, cin), lambda i: (i, 0)),            # xs tile
            pl.BlockSpec((cin_rows + 3 * LANE, LANE), lambda i: (0, 0)),  # weights
            pl.BlockSpec((SUBLANE, LANE), lambda i: (0, 0)),              # biases/LN
        ],
        out_specs=pl.BlockSpec((tile_rows, LANE), lambda i: (i, 0)),
        compiler_params=pltpu.CompilerParams(
            dimension_semantics=("parallel",)),
    )(xs_p, w_slab, bias_slab)

    enc_states = out_p[:rows, :D_PROJ].astype(jnp.float32).reshape(N, Tp, D_PROJ)

    # TODO(synk): NeMo's exact conv-subsampling length formula replaced by // SUB.
    encoded_len = jnp.minimum(x_len.astype(jnp.int32) // SUB, Tp)

    # lens_to_mask: one broadcasted compare; no separate kernel launch needed.
    enc_mask = jnp.arange(Tp, dtype=jnp.int32)[None, :] < encoded_len[:, None]

    return enc_states, encoded_len, enc_mask


if __name__ == "__main__":
    N, T, C = 2, 16, 8
    key = jax.random.PRNGKey(0)
    k = jax.random.split(key, 6)

    params = {
        "w_sub":   0.05 * jax.random.normal(k[0], (SUB * C, D_MODEL), jnp.float32),
        "b_sub":   jnp.zeros((1, D_MODEL), jnp.float32),
        "w1":      0.05 * jax.random.normal(k[1], (D_MODEL, D_FF), jnp.float32),
        "b1":      jnp.zeros((1, D_FF), jnp.float32),
        "w2":      0.05 * jax.random.normal(k[2], (D_FF, D_MODEL), jnp.float32),
        "b2":      jnp.zeros((1, D_MODEL), jnp.float32),
        "ln_gamma": jnp.ones((1, D_MODEL), jnp.float32),
        "ln_beta":  jnp.zeros((1, D_MODEL), jnp.float32),
        "w_proj":  0.05 * jax.random.normal(k[3], (D_MODEL, D_PROJ), jnp.float32),
        "b_proj":  jnp.zeros((1, D_PROJ), jnp.float32),
    }

    x = jax.random.normal(k[4], (N, T, C), jnp.float32)
    x_len = jnp.array([16, 10], dtype=jnp.int32)

    fwd = jax.jit(encoder_wrapper_forward)
    enc_states, encoded_len, enc_mask = fwd(params, x, x_len)
    jax.block_until_ready((enc_states, encoded_len, enc_mask))

    assert enc_states.shape == (N, T // SUB, D_PROJ)
    assert encoded_len.shape == (N,)
    assert enc_mask.shape == (N, T // SUB)
    assert enc_mask.dtype == jnp.bool_
    assert bool(jnp.all(jnp.isfinite(enc_states)))

    print("KERNEL_OK")
</pallas_src>

<mosaic_0001>
module attributes {stable_mosaic.version = 11 : i64} {
  func.func @_encoder_kernel(%arg0: i32, %arg1: memref<16x32xbf16, #tpu.memory_space<vmem>>, %arg2: memref<512x128xbf16, #tpu.memory_space<vmem>>, %arg3: memref<8x128xf32, #tpu.memory_space<vmem>>, %arg4: memref<16x128xbf16, #tpu.memory_space<vmem>>) attributes {dimension_semantics = [#tpu.dimension_semantics<parallel>], iteration_bounds = array<i64: 1>, scalar_prefetch = 0 : i64, scratch_operands = 0 : i64, tpu.core_type = #tpu.core_type<tc>, window_params = [{transform_indices = @transform_0, window_bounds = array<i64: 16, 32>}, {pipeline_mode = #tpu.pipeline_mode<synchronous>, transform_indices = @transform_1, window_bounds = array<i64: 512, 128>}, {pipeline_mode = #tpu.pipeline_mode<synchronous>, transform_indices = @transform_2, window_bounds = array<i64: 8, 128>}, {transform_indices = @transform_3, window_bounds = array<i64: 16, 128>}]} {
    %c0 = arith.constant 0 : index
    %c0_0 = arith.constant 0 : index
    %0 = vector.load %arg3[%c0, %c0_0] : memref<8x128xf32, #tpu.memory_space<vmem>>, vector<1x128xf32>
    %c1 = arith.constant 1 : index
    %c0_1 = arith.constant 0 : index
    %1 = vector.load %arg3[%c1, %c0_1] : memref<8x128xf32, #tpu.memory_space<vmem>>, vector<1x128xf32>
    %c2 = arith.constant 2 : index
    %c0_2 = arith.constant 0 : index
    %2 = vector.load %arg3[%c2, %c0_2] : memref<8x128xf32, #tpu.memory_space<vmem>>, vector<1x128xf32>
    %c3 = arith.constant 3 : index
    %c0_3 = arith.constant 0 : index
    %3 = vector.load %arg3[%c3, %c0_3] : memref<8x128xf32, #tpu.memory_space<vmem>>, vector<1x128xf32>
    %c4 = arith.constant 4 : index
    %c0_4 = arith.constant 0 : index
    %4 = vector.load %arg3[%c4, %c0_4] : memref<8x128xf32, #tpu.memory_space<vmem>>, vector<1x128xf32>
    %c5 = arith.constant 5 : index
    %c0_5 = arith.constant 0 : index
    %5 = vector.load %arg3[%c5, %c0_5] : memref<8x128xf32, #tpu.memory_space<vmem>>, vector<1x128xf32>
    %c0_6 = arith.constant 0 : index
    %c0_7 = arith.constant 0 : index
    %6 = vector.load %arg1[%c0_6, %c0_7] : memref<16x32xbf16, #tpu.memory_space<vmem>>, vector<16x32xbf16>
    %c0_8 = arith.constant 0 : index
    %c0_9 = arith.constant 0 : index
    %7 = vector.load %arg2[%c0_8, %c0_9] : memref<512x128xbf16, #tpu.memory_space<vmem>>, vector<32x128xbf16>
    %cst = arith.constant dense<0.000000e+00> : vector<16x128xf32>
    %8 = tpu.matmul %6, %7, %cst {dimension_numbers = #tpu.dot_dimension_numbers<[1], [0], [0], [1], [0, 0, 1, 1], [], []>} : vector<16x32xbf16>, vector<32x128xbf16>, vector<16x128xf32> -> vector<16x128xf32>
    %9 = vector.broadcast %0 : vector<1x128xf32> to vector<16x128xf32>
    %10 = arith.addf %8, %9 : vector<16x128xf32>
    %cst_10 = arith.constant 0.000000e+00 : f32
    %11 = vector.broadcast %cst_10 : f32 to vector<16x128xf32>
    %12 = arith.maximumf %10, %11 : vector<16x128xf32>
    %13 = arith.truncf %12 : vector<16x128xf32> to vector<16x128xbf16>
    %c128 = arith.constant 128 : index
    %c0_11 = arith.constant 0 : index
    %14 = vector.load %arg2[%c128, %c0_11] : memref<512x128xbf16, #tpu.memory_space<vmem>>, vector<128x128xbf16>
    %cst_12 = arith.constant dense<0.000000e+00> : vector<16x128xf32>
    %15 = tpu.matmul %13, %14, %cst_12 {dimension_numbers = #tpu.dot_dimension_numbers<[1], [0], [0], [1], [0, 0, 1, 1], [], []>} : vector<16x128xbf16>, vector<128x128xbf16>, vector<16x128xf32> -> vector<16x128xf32>
    %16 = vector.broadcast %1 : vector<1x128xf32> to vector<16x128xf32>
    %17 = arith.addf %15, %16 : vector<16x128xf32>
    %cst_13 = arith.constant 0.000000e+00 : f32
    %18 = vector.broadcast %cst_13 : f32 to vector<16x128xf32>
    %19 = arith.maximumf %17, %18 : vector<16x128xf32>
    %20 = arith.truncf %19 : vector<16x128xf32> to vector<16x128xbf16>
    %c256 = arith.constant 256 : index
    %c0_14 = arith.constant 0 : index
    %21 = vector.load %arg2[%c256, %c0_14] : memref<512x128xbf16, #tpu.memory_space<vmem>>, vector<128x128xbf16>
    %cst_15 = arith.constant dense<0.000000e+00> : vector<16x128xf32>
    %22 = tpu.matmul %20, %21, %cst_15 {dimension_numbers = #tpu.dot_dimension_numbers<[1], [0], [0], [1], [0, 0, 1, 1], [], []>} : vector<16x128xbf16>, vector<128x128xbf16>, vector<16x128xf32> -> vector<16x128xf32>
    %23 = vector.broadcast %2 : vector<1x128xf32> to vector<16x128xf32>
    %24 = arith.addf %22, %23 : vector<16x128xf32>
    %cst_16 = arith.constant 5.000000e-01 : f32
    %25 = vector.broadcast %cst_16 : f32 to vector<16x128xf32>
    %26 = arith.mulf %25, %24 : vector<16x128xf32>
    %27 = arith.addf %12, %26 : vector<16x128xf32>
    %cst_17 = arith.constant dense<0.000000e+00> : vector<16xf32>
    %28 = vector.multi_reduction <add>, %27, %cst_17 [1] : vector<16x128xf32> to vector<16xf32>
    %29 = vector.shape_cast %28 : vector<16xf32> to vector<16x1xf32>
    %cst_18 = arith.constant 3.125000e-02 : f32
    %30 = vector.broadcast %cst_18 : f32 to vector<16x1xf32>
    %31 = arith.mulf %29, %30 : vector<16x1xf32>
    %32 = arith.mulf %27, %27 : vector<16x128xf32>
    %cst_19 = arith.constant dense<0.000000e+00> : vector<16xf32>
    %33 = vector.multi_reduction <add>, %32, %cst_19 [1] : vector<16x128xf32> to vector<16xf32>
    %34 = vector.shape_cast %33 : vector<16xf32> to vector<16x1xf32>
    %cst_20 = arith.constant 3.125000e-02 : f32
    %35 = vector.broadcast %cst_20 : f32 to vector<16x1xf32>
    %36 = arith.mulf %34, %35 : vector<16x1xf32>
    %37 = arith.mulf %31, %31 : vector<16x1xf32>
    %38 = arith.subf %36, %37 : vector<16x1xf32>
    %39 = vector.broadcast %31 : vector<16x1xf32> to vector<16x128xf32>
    %40 = arith.subf %27, %39 : vector<16x128xf32>
    %cst_21 = arith.constant 9.99999974E-6 : f32
    %41 = vector.broadcast %cst_21 : f32 to vector<16x1xf32>
    %42 = arith.addf %38, %41 : vector<16x1xf32>
    %43 = math.rsqrt %42 : vector<16x1xf32>
    %44 = vector.broadcast %43 : vector<16x1xf32> to vector<16x128xf32>
    %45 = arith.mulf %40, %44 : vector<16x128xf32>
    %46 = vector.broadcast %3 : vector<1x128xf32> to vector<16x128xf32>
    %47 = arith.mulf %45, %46 : vector<16x128xf32>
    %48 = vector.broadcast %4 : vector<1x128xf32> to vector<16x128xf32>
    %49 = arith.addf %47, %48 : vector<16x128xf32>
    %50 = arith.truncf %49 : vector<16x128xf32> to vector<16x128xbf16>
    %c384 = arith.constant 384 : index
    %c0_22 = arith.constant 0 : index
    %51 = vector.load %arg2[%c384, %c0_22] : memref<512x128xbf16, #tpu.memory_space<vmem>>, vector<128x128xbf16>
    %cst_23 = arith.constant dense<0.000000e+00> : vector<16x128xf32>
    %52 = tpu.matmul %50, %51, %cst_23 {dimension_numbers = #tpu.dot_dimension_numbers<[1], [0], [0], [1], [0, 0, 1, 1], [], []>} : vector<16x128xbf16>, vector<128x128xbf16>, vector<16x128xf32> -> vector<16x128xf32>
    %53 = vector.broadcast %5 : vector<1x128xf32> to vector<16x128xf32>
    %54 = arith.addf %52, %53 : vector<16x128xf32>
    %55 = arith.truncf %54 : vector<16x128xf32> to vector<16x128xbf16>
    %c0_24 = arith.constant 0 : index
    %c0_25 = arith.constant 0 : index
    %56 = vector.load %arg4[%c0_24, %c0_25] : memref<16x128xbf16, #tpu.memory_space<vmem>>, vector<16x128xbf16>
    tpu.vector_store %arg4[%c0_24, %c0_25], %55 {strides = array<i32>} : memref<16x128xbf16, #tpu.memory_space<vmem>>, vector<16x128xbf16>,
    return
  }
  func.func @transform_0(%arg0: i32) -> (i32, i32) {
    %c0_i32 = arith.constant 0 : i32
    %c0_i32_0 = arith.constant 0 : i32
    return %arg0, %c0_i32 : i32, i32
  }
  func.func @transform_1(%arg0: i32) -> (i32, i32) {
    %c0_i32 = arith.constant 0 : i32
    %c0_i32_0 = arith.constant 0 : i32
    %c0_i32_1 = arith.constant 0 : i32
    return %c0_i32, %c0_i32_0 : i32, i32
  }
  func.func @transform_2(%arg0: i32) -> (i32, i32) {
    %c0_i32 = arith.constant 0 : i32
    %c0_i32_0 = arith.constant 0 : i32
    %c0_i32_1 = arith.constant 0 : i32
    return %c0_i32, %c0_i32_0 : i32, i32
  }
  func.func @transform_3(%arg0: i32) -> (i32, i32) {
    %c0_i32 = arith.constant 0 : i32
    %c0_i32_0 = arith.constant 0 : i32
    return %arg0, %c0_i32 : i32, i32
  }
}

</mosaic_0001>

<bundles_post_ra>
// kernel: encoder_wrapper_forward.1
= control target key start
LH: loop header
LB: loop body
LE: loop exit
PB: predicated region body
PF: predicated region fallthrough
CT: control target
= control target key end

     0   :  { %v657_v0 = vmov 0.0   ;;  %vm658_vm0 = vmmov 0   ;;  %vm48_vm1 = vcmask 261120   ;;  %s815_s1 = inlined_call_operand.vmem [shape: bf16[512,128], index: 1, kind: input, shape index: {}]   ;;  %s816_s0 = inlined_call_operand.vmem [shape: bf16[16,32], index: 0, kind: input, shape index: {}]   ;;  %s817_s2 = inlined_call_operand.vmem [shape: f32[8,128], index: 2, kind: input, shape index: {}]   ;;  %s818_s3 = inlined_call_operand.vmem [shape: bf16[16,128], index: 3, kind: output, shape index: {}]  }
   0x1   :  { %556 = vmatprep.subr.bf16.mxu0 %v657_v0  ;;  %v626_v1 = vld [vmem:[%s815_s1] sm:$0xff]   ;;  %560 = vmatprep.mubr.msk.bf16.mxu0 %vm658_vm0, %v657_v0  ;;  %v627_v2 = vld [vmem:[%s815_s1 + $0x8] sm:$0xff]   ;;  %v631_v6 = vld [vmem:[%s815_s1 + $0x50] sm:$0xff]  }
   0x2   :  { %564 = vmatprep.subr.bf16.mxu1 %v657_v0  ;;  %580 = vmatprep.mubr.msk.bf16.mxu1 %vm658_vm0, %v657_v0  ;;  %v629_v3 = vld [vmem:[%s815_s1 + $0x40] sm:$0xff]   ;;  %v630_v5 = vld [vmem:[%s815_s1 + $0x48] sm:$0xff]   ;;  %v632_v7 = vld [vmem:[%s815_s1 + $0x58] sm:$0xff]  }
   0x3   :  { %557 = vmatpush3.bf16.msra.mxu0 %v626_v1  ;;  %v628_v4 = vld [vmem:[%s816_s0] sm:$0xff]   ;;  %565 = vmatpush3.bf16.msra.mxu1 %v629_v3  ;;  %v634_v9 = vld [vmem:[%s815_s1 + $0x68] sm:$0xff]   ;;  %v635_v10 = vld [vmem:[%s815_s1 + $0x70] sm:$0xff]  }
   0x4   :  { %558 = vmatprep.subr.bf16.mxu0 %v657_v0  ;;  %566 = vmatprep.subr.bf16.mxu1 %v657_v0  ;;  %v633_v8 = vld [vmem:[%s815_s1 + $0x60] sm:$0xff]   ;;  %v636_v11 = vld [vmem:[%s815_s1 + $0x78] sm:$0xff]   ;;  %v638_v13 = vld [vmem:[%s815_s1 + $0x88] sm:$0xff]  }
   0x5   :  { %v637_v12 = vld [vmem:[%s815_s1 + $0x80] sm:$0xff]   ;;  %v639_v14 = vld [vmem:[%s815_s1 + $0x90] sm:$0xff]   ;;  %v640_v15 = vld [vmem:[%s815_s1 + $0x98] sm:$0xff]  }
   0x6   :  { %v641_v16 = vld [vmem:[%s815_s1 + $0xa0] sm:$0xff]   ;;  %v642_v17 = vld [vmem:[%s815_s1 + $0xa8] sm:$0xff]   ;;  %v643_v28 = vld [vmem:[%s815_s1 + $0xb0] sm:$0xff]  }
   0x7   :  { %559 = vmatpush3.bf16.msra.mxu0 %v627_v2  ;;  %567 = vmatpush3.bf16.msra.mxu1 %v630_v5  ;;  %v483_v18 = vld [vmem:[%s817_s2] ss:$0 sm:$0xff]  ;;  %v644_v29 = vld [vmem:[%s815_s1 + $0xb8] sm:$0xff]   ;;  %v488_v30 = vld [vmem:[%s817_s2 + $0x1] ss:$0 sm:$0xff] }
   0x8   :  { %584 = vmatprep.subr.bf16.mxu0 %v657_v0  ;;  %568 = vmatprep.subr.bf16.mxu1 %v657_v0  ;;  %v497_v40 = vld [vmem:[%s817_s2 + $0x2] ss:$0 sm:$0xff]  ;;  %v646_v54 = vld [vmem:[%s815_s1 + $0xc8] sm:$0xff]   ;;  %v647_v55 = vld [vmem:[%s815_s1 + $0xd0] sm:$0xff]  }
   0x9   :  { %v645_v53 = vld [vmem:[%s815_s1 + $0xc0] sm:$0xff]   ;;  %v648_v56 = vld [vmem:[%s815_s1 + $0xd8] sm:$0xff]   ;;  %v650_v58 = vld [vmem:[%s815_s1 + $0xe8] sm:$0xff]  }
   0xa   :  { %561 = vmatmul.mubr.msk.bf16.vlgmr.msra.gmra.mrb[0].mxu0 %vm48_vm1, %v628_v4  ;;  %v649_v57 = vld [vmem:[%s815_s1 + $0xe0] sm:$0xff]   ;;  %v651_v59 = vld [vmem:[%s815_s1 + $0xf0] sm:$0xff]   ;;  %v652_v60 = vld [vmem:[%s815_s1 + $0xf8] sm:$0xff]  }
   0xb   :  { %600 = vmatprep.mubr.msk.bf16.mxu0 %vm658_vm0, %v657_v0  ;;  %569 = vmatpush3.bf16.msra.mxu1 %v631_v6 }
   0xc   :  { %570 = vmatprep.subr.bf16.mxu1 %v657_v0  ;;  %585 = vmatpush3.bf16.msra.mxu0 %v637_v12 }
   0xd   :  { %586 = vmatprep.subr.bf16.mxu0 %v657_v0 }
   0xf   :  { %571 = vmatpush3.bf16.msra.mxu1 %v632_v7 }
  0x10   :  { %572 = vmatprep.subr.bf16.mxu1 %v657_v0  ;;  %587 = vmatpush3.bf16.msra.mxu0 %v638_v13 }
  0x11   :  { %588 = vmatprep.subr.bf16.mxu0 %v657_v0 }
  0x13   :  { %573 = vmatpush3.bf16.msra.mxu1 %v633_v8 }
  0x14   :  { %574 = vmatprep.subr.bf16.mxu1 %v657_v0  ;;  %589 = vmatpush3.bf16.msra.mxu0 %v639_v14  ;;  %v506_v14 = vld [vmem:[%s817_s2 + $0x3] ss:$0 sm:$0xff] }
  0x15   :  { %590 = vmatprep.subr.bf16.mxu0 %v657_v0 }
  0x17   :  { %575 = vmatpush3.bf16.msra.mxu1 %v634_v9 }
  0x18   :  { %576 = vmatprep.subr.bf16.mxu1 %v657_v0  ;;  %591 = vmatpush3.bf16.msra.mxu0 %v640_v15 }
  0x19   :  { %592 = vmatprep.subr.bf16.mxu0 %v657_v0 }
  0x1b   :  { %577 = vmatpush3.bf16.msra.mxu1 %v635_v10 }
  0x1c   :  { %578 = vmatprep.subr.bf16.mxu1 %v657_v0  ;;  %593 = vmatpush3.bf16.msra.mxu0 %v641_v16 }
  0x1d   :  { %594 = vmatprep.subr.bf16.mxu0 %v657_v0 }
  0x1f   :  { %579 = vmatpush3.bf16.msra.mxu1 %v636_v11 }
  0x20   :  { %604 = vmatprep.subr.bf16.mxu1 %v657_v0  ;;  %595 = vmatpush3.bf16.msra.mxu0 %v642_v17 }
  0x21   :  { %596 = vmatprep.subr.bf16.mxu0 %v657_v0 }
  0x24   :  { %597 = vmatpush3.bf16.msra.mxu0 %v643_v28 }
  0x25   :  { %598 = vmatprep.subr.bf16.mxu0 %v657_v0 }
  0x28   :  { %599 = vmatpush3.bf16.msra.mxu0 %v644_v29 }
  0xdd   :  { %v86_v19 = vpop.f32.mrb[0].mxu0 }
  0xde   :  { %v87_v20 = vadd.f32 %v483_v18, %v86_v19  ;;  %v562_v21 = vpop.f32.mrb[1].mxu0  ;;  %v507_v19 = vld [vmem:[%s817_s2 + $0x4] ss:$0 sm:$0xff] }
  0xdf   :  { %v89_v22 = vpop.f32.mrb[2].mxu0 }
  0xe0   :  { %v90_v23 = vadd.f32 %v483_v18, %v89_v22  ;;  %v563_v24 = vpop.f32.mrb[3].mxu0  ;;  %v93_v25 = vmax.f32 %v87_v20, 0.0 }
  0xe1   :  { %v508_v24 = vld [vmem:[%s817_s2 + $0x5] ss:$0 sm:$0xff] }
  0xe2   :  { %v94_v26 = vmax.f32 %v90_v23, 0.0 }
  0xe4   :  { %v95_v27 = vpack.c.bf16 %v94_v26, %v93_v25 }
  0xe6   :  { %581 = vmatmul.mubr.bf16.vlgmr.msra.gmra.mrb[0].mxu1 %v95_v27 }
  0xe7   :  { %620 = vmatprep.mubr.msk.bf16.mxu1 %vm658_vm0, %v657_v0  ;;  %605 = vmatpush3.bf16.msra.mxu1 %v645_v53 }
  0xe8   :  { %606 = vmatprep.subr.bf16.mxu1 %v657_v0 }
  0xeb   :  { %607 = vmatpush3.bf16.msra.mxu1 %v646_v54 }
  0xec   :  { %608 = vmatprep.subr.bf16.mxu1 %v657_v0 }
  0xef   :  { %609 = vmatpush3.bf16.msra.mxu1 %v647_v55 }
  0xf0   :  { %610 = vmatprep.subr.bf16.mxu1 %v657_v0 }
  0xf3   :  { %611 = vmatpush3.bf16.msra.mxu1 %v648_v56 }
  0xf4   :  { %612 = vmatprep.subr.bf16.mxu1 %v657_v0 }
  0xf7   :  { %613 = vmatpush3.bf16.msra.mxu1 %v649_v57 }
  0xf8   :  { %614 = vmatprep.subr.bf16.mxu1 %v657_v0 }
  0xfb   :  { %615 = vmatpush3.bf16.msra.mxu1 %v650_v58 }
  0xfc   :  { %616 = vmatprep.subr.bf16.mxu1 %v657_v0 }
  0xff   :  { %617 = vmatpush3.bf16.msra.mxu1 %v651_v59 }
 0x100   :  { %618 = vmatprep.subr.bf16.mxu1 %v657_v0 }
 0x103   :  { %619 = vmatpush3.bf16.msra.mxu1 %v652_v60 }
 0x1b9   :  { %v198_v31 = vpop.f32.mrb[0].mxu1 }
 0x1ba   :  { %v199_v32 = vadd.f32 %v488_v30, %v198_v31  ;;  %v582_v33 = vpop.f32.mrb[1].mxu1 }
 0x1bb   :  { %v201_v34 = vpop.f32.mrb[2].mxu1 }
 0x1bc   :  { %v202_v35 = vadd.f32 %v488_v30, %v201_v34  ;;  %v583_v36 = vpop.f32.mrb[3].mxu1  ;;  %v205_v37 = vmax.f32 %v199_v32, 0.0 }
 0x1be   :  { %v206_v38 = vmax.f32 %v202_v35, 0.0 }
 0x1c0   :  { %v207_v39 = vpack.c.bf16 %v206_v38, %v205_v37 }
 0x1c2   :  { %601 = vmatmul.mubr.bf16.vlgmr.msra.gmra.mrb[4].mxu0 %v207_v39 }
 0x295   :  { %v310_v41 = vpop.f32.mrb[4].mxu0 }
 0x296   :  { %v311_v42 = vadd.f32 %v497_v40, %v310_v41  ;;  %v602_v43 = vpop.f32.mrb[5].mxu0 }
 0x297   :  { %v313_v44 = vpop.f32.mrb[6].mxu0 }
 0x298   :  { %v317_v45 = vmul.f32 0.5, %v311_v42  ;;  %v314_v46 = vadd.f32 %v497_v40, %v313_v44  ;;  %v603_v47 = vpop.f32.mrb[7].mxu0 }
 0x29a   :  { %v319_v48 = vadd.f32 %v317_v45, %v93_v25  ;;  %v318_v49 = vmul.f32 0.5, %v314_v46 }
 0x29c   :  { %v320_v50 = vadd.f32 %v318_v49, %v94_v26  ;;  %321 = vadd.xlane.f32.xlu0 %v319_v48  ;;  %v327_v51 = vmul.f32 %v319_v48, %v319_v48 }
 0x29e   :  { %329 = vadd.xlane.f32.xlu1 %v327_v51  ;;  %v328_v52 = vmul.f32 %v320_v50, %v320_v50 }
 0x2a0   :  { %323 = vadd.xlane.f32.xlu0 %v320_v50 }
 0x2a2   :  { %331 = vadd.xlane.f32.xlu1 %v328_v52 }
 0x329   :  { %v322_v61 = vpop.xlane.xlu0 %321 }
 0x32a   :  { %v325_v62 = vmul.f32 0.03125, %v322_v61 }
 0x32b   :  { %v330_v63 = vpop.xlane.xlu1 %329 }
 0x32c   :  { %v335_v1 = vmul.f32 %v325_v62, %v325_v62  ;;  %v333_v2 = vmul.f32 0.03125, %v330_v63  ;;  %v339_v12 = vsub.f32 %v319_v48, %v325_v62 }
 0x32d   :  { %v324_v3 = vpop.xlane.xlu0 %323 }
 0x32e   :  { %v337_v4 = vsub.f32 %v333_v2, %v335_v1  ;;  %v326_v5 = vmul.f32 0.03125, %v324_v3 }
 0x32f   :  { %v332_v6 = vpop.xlane.xlu1 %331 }
 0x330   :  { %v341_v7 = vadd.f32 1e-05, %v337_v4  ;;  %v336_v8 = vmul.f32 %v326_v5, %v326_v5  ;;  %v334_v9 = vmul.f32 0.03125, %v332_v6  ;;  %v340_v15 = vsub.f32 %v320_v50, %v326_v5 }
 0x332   :  { %653 = vrsqrt.f32 %v341_v7  ;;  %v338_v10 = vsub.f32 %v334_v9, %v336_v8 }
 0x334   :  { %v342_v11 = vadd.f32 1e-05, %v338_v10 }
 0x336   :  { %655 = vrsqrt.f32 %v342_v11 }
 0x33c   :  { %v654_v13 = vpop.eup %653 }
 0x33d   :  { %v345_v0 = vmul.f32 %v654_v13, %v339_v12 }
 0x33f   :  { %v351_v18 = vmul.f32 %v506_v14, %v345_v0 }
 0x340   :  { %v656_v16 = vpop.eup %655 }
 0x341   :  { %v346_v17 = vmul.f32 %v656_v16, %v340_v15  ;;  %v357_v21 = vadd.f32 %v507_v19, %v351_v18 }
 0x343   :  { %v352_v20 = vmul.f32 %v506_v14, %v346_v17 }
 0x345   :  { %v358_v22 = vadd.f32 %v507_v19, %v352_v20 }
 0x347   :  { %v359_v23 = vpack.c.bf16 %v358_v22, %v357_v21 }
 0x349   :  { %621 = vmatmul.mubr.bf16.vlgmr.msra.gmra.mrb[4].mxu1 %v359_v23 }
 0x41c   :  { %v462_v25 = vpop.f32.mrb[4].mxu1 }
 0x41d   :  { %v622_v26 = vpop.f32.mrb[5].mxu1  ;;  %v463_v28 = vadd.f32 %v508_v24, %v462_v25 }
 0x41e   :  { %v465_v27 = vpop.f32.mrb[6].mxu1 }
 0x41f   :  { %v466_v29 = vadd.f32 %v508_v24, %v465_v27  ;;  %v623_v30 = vpop.f32.mrb[7].mxu1 }
 0x421   :  { %v524_v31 = vpack.c.bf16 %v466_v29, %v463_v28 }
 0x423   :  { %525 = vst [vmem:[%s818_s3] sm:$0xff] %v524_v31  }

</bundles_post_ra>
